<compile_context>
chip_gen: v5e
topology: v5e:2x2
jax: 0.10.0
libtpu: 0.0.40
codegen_flags: <defaults>
</compile_context>

<pallas_src>
import jax
import jax.numpy as jnp
from jax.experimental import pallas as pl
from jax.experimental.pallas import tpu as pltpu

_LANE = 128      # vreg lane width
_SUBLANE = 8     # vreg sublane height
_VMEM_BUDGET_BYTES = 24 * 1024 * 1024   # stay under 32 MiB default scoped VMEM


def _round_up(x, m):
    return (x + m - 1) // m * m


def _selector_logits_kernel(x_ref, wt_ref, b_ref, o_ref):
    # Hot path: MXU matmul with f32 accumulation + broadcast bias add on VPU.
    logits = jnp.dot(x_ref[...], wt_ref[...], preferred_element_type=jnp.float32)
    o_ref[...] = (logits + b_ref[...]).astype(o_ref.dtype)


def _choose_tiles(n8, d, c_pad):
    """Pick (tm, tn): lane-dense class tile first, then biggest row tile that
    keeps the double-buffered working set under the VMEM budget."""
    tn_opts = [t for t in (1024, 512, 256, 128) if c_pad % t == 0] or [_LANE]
    tm_opts = [t for t in (512, 256, 128, 64, 32, 16, 8) if t <= max(n8, _SUBLANE)]
    if not tm_opts:
        tm_opts = [_SUBLANE]

    def footprint(tm, tn):
        # x tile + W^T tile + out tile + bias tile, each double-buffered, f32.
        return 2 * (tm * d + d * tn + tm * tn + tn) * 4

    for tn in tn_opts:
        for tm in tm_opts:
            if footprint(tm, tn) <= _VMEM_BUDGET_BYTES:
                return tm, tn
    # Fallback (very large D): smallest legal tiles, accept the footprint.
    return tm_opts[-1], tn_opts[-1]


def prepare_selector_params(relation_weight, bias):
    """One-time weight prep (hoisted out of the per-call path).

    relation_weight: (C, D) f32, bias: (C,) f32
    -> w_t_pad: (D, C_pad) f32, b_pad: (1, C_pad) f32 with C_pad = round_up(C, 128)
    """
    c, d = relation_weight.shape
    c_pad = _round_up(c, _LANE)
    w_t_pad = jnp.zeros((d, c_pad), relation_weight.dtype).at[:, :c].set(
        relation_weight.T)
    b_pad = jnp.zeros((1, c_pad), bias.dtype).at[:, :c].set(bias)
    return w_t_pad, b_pad


def selector_get_logits(x, w_t_pad, b_pad, num_classes):
    """x: (N, D) f32, w_t_pad: (D, C_pad) f32, b_pad: (1, C_pad) f32 -> (N, num_classes) f32."""
    n, d = x.shape
    d2, c_pad = w_t_pad.shape
    assert d == d2 and c_pad % _LANE == 0

    n8 = _round_up(n, _SUBLANE)
    tm, tn = _choose_tiles(n8, d, c_pad)
    n_pad = _round_up(n, tm)
    x_pad = x if n_pad == n else jnp.pad(x, ((0, n_pad - n), (0, 0)))

    grid = (c_pad // tn, n_pad // tm)   # rows innermost -> W^T tile reused across rows

    cost = pl.CostEstimate(
        flops=2 * n * d * num_classes,
        transcendentals=0,
        bytes_accessed=4 * (n * d + d * num_classes + n * num_classes + num_classes),
    )

    out = pl.pallas_call(
        _selector_logits_kernel,
        out_shape=jax.ShapeDtypeStruct((n_pad, c_pad), jnp.float32),
        grid_spec=pltpu.PrefetchScalarGridSpec(
            num_scalar_prefetch=0,
            grid=grid,
            in_specs=[
                pl.BlockSpec((tm, d), lambda j, i: (i, 0)),   # x: streams over rows
                pl.BlockSpec((d, tn), lambda j, i: (0, j)),   # W^T: constant over inner axis
                pl.BlockSpec((1, tn), lambda j, i: (0, j)),   # bias
            ],
            out_specs=pl.BlockSpec((tm, tn), lambda j, i: (i, j)),
        ),
        compiler_params=pltpu.CompilerParams(
            dimension_semantics=("parallel", "parallel")),
        cost_estimate=cost,
    )(x_pad, w_t_pad, b_pad)

    return out[:n, :num_classes]


def init_selector_params(key, num_classes, relation_dim):
    """Deterministic synthetic init mirroring Selector.init_weights()."""
    k_rel, k_bias, k_att = jax.random.split(key, 3)
    # xavier_uniform for (num_classes, relation_dim): bound = sqrt(6/(fan_in+fan_out))
    bound = (6.0 / (num_classes + relation_dim)) ** 0.5
    relation_weight = jax.random.uniform(
        k_rel, (num_classes, relation_dim), jnp.float32, -bound, bound)
    bias = jax.random.normal(k_bias, (num_classes,), jnp.float32)
    attention_weight = jax.random.uniform(
        k_att, (num_classes, relation_dim), jnp.float32, -bound, bound)
    # TODO(synk): attention_matrix is unused by get_logits (forward()/test() are NotImplementedError upstream).
    return relation_weight, bias, attention_weight


if __name__ == "__main__":
    key = jax.random.PRNGKey(0)
    num_classes = 16
    relation_dim = 32
    batch = 8

    k_params, k_x = jax.random.split(key)
    relation_weight, bias, _attention_weight = init_selector_params(
        k_params, num_classes, relation_dim)
    x = jax.random.normal(k_x, (batch, relation_dim), jnp.float32)

    # One-time weight preparation (transpose + lane padding), then the kernel.
    w_t_pad, b_pad = prepare_selector_params(relation_weight, bias)
    logits = selector_get_logits(x, w_t_pad, b_pad, num_classes)
    jax.block_until_ready(logits)

    # correctness check against pure-JAX reference
    ref = x @ relation_weight.T + bias
    assert logits.shape == (batch, num_classes)
    assert jnp.allclose(logits, ref, atol=1e-5, rtol=1e-5)

    print("KERNEL_OK")
</pallas_src>

<mosaic_0001>
module attributes {stable_mosaic.version = 11 : i64} {
  func.func @_selector_logits_kernel(%arg0: i32, %arg1: i32, %arg2: memref<8x32xf32, #tpu.memory_space<vmem>>, %arg3: memref<32x128xf32, #tpu.memory_space<vmem>>, %arg4: memref<1x128xf32, #tpu.memory_space<vmem>>, %arg5: memref<8x128xf32, #tpu.memory_space<vmem>>) attributes {dimension_semantics = [#tpu.dimension_semantics<parallel>, #tpu.dimension_semantics<parallel>], iteration_bounds = array<i64: 1, 1>, scalar_prefetch = 0 : i64, scratch_operands = 0 : i64, tpu.core_type = #tpu.core_type<tc>, window_params = [{transform_indices = @transform_0, window_bounds = array<i64: 8, 32>}, {transform_indices = @transform_1, window_bounds = array<i64: 32, 128>}, {transform_indices = @transform_2, window_bounds = array<i64: 1, 128>}, {transform_indices = @transform_3, window_bounds = array<i64: 8, 128>}]} {
    %c0 = arith.constant 0 : index
    %c0_0 = arith.constant 0 : index
    %0 = vector.load %arg2[%c0, %c0_0] : memref<8x32xf32, #tpu.memory_space<vmem>>, vector<8x32xf32>
    %c0_1 = arith.constant 0 : index
    %c0_2 = arith.constant 0 : index
    %1 = vector.load %arg3[%c0_1, %c0_2] : memref<32x128xf32, #tpu.memory_space<vmem>>, vector<32x128xf32>
    %cst = arith.constant dense<0.000000e+00> : vector<8x128xf32>
    %2 = tpu.matmul %0, %1, %cst {dimension_numbers = #tpu.dot_dimension_numbers<[1], [0], [0], [1], [0, 0, 1, 1], [], []>} : vector<8x32xf32>, vector<32x128xf32>, vector<8x128xf32> -> vector<8x128xf32>
    %c0_3 = arith.constant 0 : index
    %c0_4 = arith.constant 0 : index
    %3 = vector.load %arg4[%c0_3, %c0_4] : memref<1x128xf32, #tpu.memory_space<vmem>>, vector<1x128xf32>
    %4 = vector.broadcast %3 : vector<1x128xf32> to vector<8x128xf32>
    %5 = arith.addf %2, %4 : vector<8x128xf32>
    %c0_5 = arith.constant 0 : index
    %c0_6 = arith.constant 0 : index
    %6 = vector.load %arg5[%c0_5, %c0_6] : memref<8x128xf32, #tpu.memory_space<vmem>>, vector<8x128xf32>
    tpu.vector_store %arg5[%c0_5, %c0_6], %5 {strides = array<i32>} : memref<8x128xf32, #tpu.memory_space<vmem>>, vector<8x128xf32>,
    return
  }
  func.func @transform_0(%arg0: i32, %arg1: i32) -> (i32, i32) {
    %c0_i32 = arith.constant 0 : i32
    %c0_i32_0 = arith.constant 0 : i32
    return %arg1, %c0_i32 : i32, i32
  }
  func.func @transform_1(%arg0: i32, %arg1: i32) -> (i32, i32) {
    %c0_i32 = arith.constant 0 : i32
    %c0_i32_0 = arith.constant 0 : i32
    return %c0_i32, %arg0 : i32, i32
  }
  func.func @transform_2(%arg0: i32, %arg1: i32) -> (i32, i32) {
    %c0_i32 = arith.constant 0 : i32
    %c0_i32_0 = arith.constant 0 : i32
    return %c0_i32, %arg0 : i32, i32
  }
  func.func @transform_3(%arg0: i32, %arg1: i32) -> (i32, i32) {
    %c0_i32 = arith.constant 0 : i32
    return %arg1, %arg0 : i32, i32
  }
}

</mosaic_0001>

<bundles_post_ra>
// kernel: tpu_custom_call.1
= control target key start
LH: loop header
LB: loop body
LE: loop exit
PB: predicated region body
PF: predicated region fallthrough
CT: control target
= control target key end

     0   :  { %8 = vsyncpa [#allocation3], 0  ;;  %s219_s0 = inlined_call_operand.hbm [shape: f32[8,32], index: 0, kind: input, shape index: {}]   ;;  %s220_s1 = inlined_call_operand.hbm [shape: f32[32,128], index: 1, kind: input, shape index: {}]   ;;  %s221_s2 = inlined_call_operand.vmem [shape: f32[1,128], index: 2, kind: input, shape index: {}]   ;;  %s222_s3 = inlined_call_operand.hbm [shape: f32[8,128], index: 3, kind: output, shape index: {}]  }
   0x1   :  { %9 = vsyncpa [#allocation6], 0 }
   0x2   :  { %10 = vsyncpa [#allocation4], 0  ;;  %s16_s14 = sshll.u32 %s219_s0, 4  ;;  %s182_s15 = smov [#allocation2]   ;;  %s17_s14 = int_to_ptr.hbm [resolvable:$true] %s16_s14 }
   0x3   :  { %s18_s16 = sshll.u32 %s182_s15, 4  ;;  %s26_s19 = sshll.u32 %s220_s1, 4  ;;  %s19_s16 = int_to_ptr.vmem [resolvable:$true] %s18_s16  ;;  %s27_s19 = int_to_ptr.hbm [resolvable:$true] %s26_s19 }
   0x4   :  { %21 = dma.hbm_to_vmem [thread:$0]  %s17_s14, 128, %s19_s16, [#allocation3]  }
   0x5   :  { %s183_s20 = smov [#allocation5]   ;;  %s184_s22 = smov 128  }
   0x6   :  { %s28_s21 = sshll.u32 %s183_s20, 4  ;;  %s185_s23 = smov 8   ;;  %s29_s21 = int_to_ptr.vmem [resolvable:$true] %s28_s21 }
   0x7   :  { %34 = dma.hbm_to_vmem [thread:$0]  %s27_s19, 512, %s29_s21, [#allocation6], %s184_s22, %s184_s22, %s185_s23  }
   0x8   :  { %176 = dma.done.wait [#allocation3], 128  }
   0x9   :  { %177 = vsyncadd [#allocation3], 4294967168 }
   0xa   :  { %178 = dma.done.wait [#allocation6], 512  }
   0xb   :  { %179 = vsyncadd [#allocation6], 4294966784  ;;  %v49_v0 = vld [vmem:[#allocation5 + $0x18] sm:$0xff]  ;;  %v48_v1 = vld [vmem:[#allocation5 + $0x10] sm:$0xff]  ;;  %vm54_vm0 = vcmask 261120   ;;  %s186_s24 = smov [#allocation7]  }
   0xc   :  { %70 = vmatpush.msra.mxu0 %v49_v0  ;;  %v47_v2 = vld [vmem:[#allocation5 + $0x8] sm:$0xff]  ;;  %v46_v3 = vld [vmem:[#allocation5] sm:$0xff]  ;;  %v45_v4 = vld [vmem:[#allocation2] sm:$0xff]  ;;  %s84_s25 = sshll.u32 %s186_s24, 4  ;;  %s86_s28 = sshll.u32 %s222_s3, 4  ;;  %s85_s25 = int_to_ptr.vmem [resolvable:$true] %s84_s25  ;;  %s87_s28 = int_to_ptr.hbm [resolvable:$true] %s86_s28 }
   0xd   :  { %v103_v5 = vld [vmem:[%s221_s2] ss:$0 sm:$0xff] }
   0xe   :  { %71 = vmatpush.msra.mxu0 %v48_v1 }
  0x10   :  { %72 = vmatpush.msra.mxu0 %v47_v2 }
  0x12   :  { %73 = vmatpush.msra.mxu0 %v46_v3 }
  0x13   :  { %97 = vmatmul.msk.f32.vlgmr.msra.gmra.mxu0 %vm54_vm0, %v45_v4 }
  0x90   :  { %v75_v6 = vpop.f32.mrf.mxu0 }
  0x91   :  { %v76_v7 = vadd.f32 %v103_v5, %v75_v6 }
  0x93   :  { %78 = vst [vmem:[#allocation7] sm:$0xff] %v76_v7 }
  0x94   :  { %89 = dma.vmem_to_hbm [thread:$0]  %s85_s25, 128, %s87_s28, [#allocation4]  }
  0x95   :  { %180 = dma.done.wait [#allocation4], 128  }
  0x96   :  { %181 = vsyncadd [#allocation4], 4294967168 }
  0x97   :  { %94 = vsyncpa [#allocation3], 1 }
  0x98   :  { %95 = vsyncpa [#allocation6], 1 }
  0x99   :  { %96 = vsyncpa [#allocation4], 1 }

</bundles_post_ra>
